<compile_context>
chip_gen: v5e
topology: v5e:2x2
jax: 0.10.0
libtpu: 0.0.40
codegen_flags: <defaults>
</compile_context>

<pallas_src>
import math

import jax
import jax.numpy as jnp
from jax.experimental import pallas as pl
from jax.experimental.pallas import tpu as pltpu

_LANES = 128
_VMEM_BUDGET = 24 * 1024 * 1024   # leave headroom under the 32 MiB limit we set
_VMEM_LIMIT = 32 * 1024 * 1024


def _make_kernel(n_inputs: int):
    def kernel(w_ref, *refs):
        # w_ref : SMEM (n_inputs,) f32 scalars
        # refs  : n_inputs VMEM (tile_r, 128) inputs, then the (tile_r, 128) output
        x_refs = refs[:n_inputs]
        o_ref = refs[n_inputs]
        acc = w_ref[0] * x_refs[0][...].astype(jnp.float32)
        for i in range(1, n_inputs):  # small static n -> unrolled VPU mul/add chain
            acc = acc + w_ref[i] * x_refs[i][...].astype(jnp.float32)
        o_ref[...] = acc.astype(o_ref.dtype)

    return kernel


def linear_weighted_sum(inputs, weights, *, target_tile_rows=2048):
    """inputs: list of arrays (same shape/dtype). weights: (n,) array-like."""
    n = len(inputs)
    assert n >= 1
    orig_shape = inputs[0].shape
    orig_dtype = inputs[0].dtype
    total = int(math.prod(orig_shape)) if orig_shape else 1
    dtype_bytes = jnp.dtype(orig_dtype).itemsize

    # Sublane packing: 8 rows/vreg for 32-bit, 16 for bf16, 32 for 8-bit dtypes.
    sub = max(8, 32 // dtype_bytes)

    rows = -(-total // _LANES)                 # ceil(total / 128)
    rows_min = -(-rows // sub) * sub           # rows padded to sublane packing

    # VMEM-aware tile size. Assume the deepest buffering we might request:
    # 3 buffers per input stream + 2 for the output stream.
    bytes_per_row_per_buf = _LANES * dtype_bytes
    max_rows_by_vmem = _VMEM_BUDGET // ((3 * n + 2) * bytes_per_row_per_buf)
    tile_r = min(target_tile_rows, max_rows_by_vmem)
    tile_r = max(sub, (tile_r // sub) * sub)   # multiple of sublane packing
    tile_r = min(tile_r, rows_min)             # never larger than the padded data

    padded_rows = -(-rows // tile_r) * tile_r
    padded_total = padded_rows * _LANES

    def to_slab(a):
        flat = a.reshape(-1)
        if padded_total != total:
            flat = jnp.pad(flat, (0, padded_total - total))
        return flat.reshape(padded_rows, _LANES)

    xs = [to_slab(a) for a in inputs]
    w = jnp.asarray(weights, dtype=jnp.float32).reshape(n)

    num_steps = padded_rows // tile_r
    grid = (num_steps,)

    # Deeper input buffering hides DMA-issue latency on long streams; skip it
    # for short grids where it is pure VMEM overhead.
    if num_steps >= 4:
        def data_spec():
            return pl.BlockSpec((tile_r, _LANES), lambda i: (i, 0),
                                pipeline_mode=pl.Buffered(3))
    else:
        def data_spec():
            return pl.BlockSpec((tile_r, _LANES), lambda i: (i, 0))

    out = pl.pallas_call(
        _make_kernel(n),
        out_shape=jax.ShapeDtypeStruct((padded_rows, _LANES), orig_dtype),
        grid_spec=pltpu.PrefetchScalarGridSpec(
            num_scalar_prefetch=0,
            grid=grid,
            in_specs=[pl.BlockSpec((n,), lambda i: (0,), memory_space=pltpu.SMEM)]
                     + [data_spec() for _ in range(n)],
            out_specs=pl.BlockSpec((tile_r, _LANES), lambda i: (i, 0)),
        ),
        compiler_params=pltpu.CompilerParams(
            dimension_semantics=("parallel",),   # megacore sharding on v7x
            vmem_limit_bytes=_VMEM_LIMIT,        # explicit, portable v5e/v6e/v7x
        ),
    )(w, *xs)

    if padded_total != total:
        return out.reshape(-1)[:total].reshape(orig_shape)
    return out.reshape(orig_shape)


if __name__ == "__main__":
    key = jax.random.PRNGKey(0)

    n_inputs = 3
    B, C, H, W = 2, 4, 16, 16  # NCHW, 2048 elements per input

    keys = jax.random.split(key, n_inputs)
    inputs = [jax.random.normal(k, (B, C, H, W), dtype=jnp.float32) for k in keys]

    # Deterministic parameter init matching nn.Parameter(torch.Tensor([1/n_inputs]))
    weights = jnp.full((n_inputs,), 1.0 / n_inputs, dtype=jnp.float32)

    out = linear_weighted_sum(inputs, weights)
    out = jax.block_until_ready(out)

    ref = sum(weights[i] * inputs[i] for i in range(n_inputs))
    assert out.shape == (B, C, H, W)
    assert jnp.allclose(out, ref, atol=1e-6, rtol=1e-6), "mismatch vs reference"

    # Ragged shape (not divisible by 128) exercises the padding path.
    keys2 = jax.random.split(jax.random.PRNGKey(1), n_inputs)
    inputs2 = [jax.random.normal(k, (2, 3, 5, 7), dtype=jnp.float32) for k in keys2]
    out2 = jax.block_until_ready(linear_weighted_sum(inputs2, weights))
    ref2 = sum(weights[i] * inputs2[i] for i in range(n_inputs))
    assert out2.shape == (2, 3, 5, 7)
    assert jnp.allclose(out2, ref2, atol=1e-6, rtol=1e-6), "ragged mismatch vs reference"

    print("KERNEL_OK")
</pallas_src>

<mosaic_0001>
module attributes {stable_mosaic.version = 11 : i64} {
  func.func @kernel(%arg0: i32, %arg1: memref<3xf32, #tpu.memory_space<smem>>, %arg2: memref<16x128xf32, #tpu.memory_space<vmem>>, %arg3: memref<16x128xf32, #tpu.memory_space<vmem>>, %arg4: memref<16x128xf32, #tpu.memory_space<vmem>>, %arg5: memref<16x128xf32, #tpu.memory_space<vmem>>) attributes {dimension_semantics = [#tpu.dimension_semantics<parallel>], iteration_bounds = array<i64: 1>, scalar_prefetch = 0 : i64, scratch_operands = 0 : i64, tpu.core_type = #tpu.core_type<tc>, window_params = [{transform_indices = @transform_0, window_bounds = array<i64: 3>}, {transform_indices = @transform_1, window_bounds = array<i64: 16, 128>}, {transform_indices = @transform_2, window_bounds = array<i64: 16, 128>}, {transform_indices = @transform_3, window_bounds = array<i64: 16, 128>}, {transform_indices = @transform_4, window_bounds = array<i64: 16, 128>}]} {
    %c0 = arith.constant 0 : index
    %0 = memref.load %arg1[%c0] : memref<3xf32, #tpu.memory_space<smem>>
    %c0_0 = arith.constant 0 : index
    %c0_1 = arith.constant 0 : index
    %1 = vector.load %arg2[%c0_0, %c0_1] : memref<16x128xf32, #tpu.memory_space<vmem>>, vector<16x128xf32>
    %2 = vector.broadcast %0 : f32 to vector<16x128xf32>
    %3 = arith.mulf %2, %1 : vector<16x128xf32>
    %c1 = arith.constant 1 : index
    %4 = memref.load %arg1[%c1] : memref<3xf32, #tpu.memory_space<smem>>
    %c0_2 = arith.constant 0 : index
    %c0_3 = arith.constant 0 : index
    %5 = vector.load %arg3[%c0_2, %c0_3] : memref<16x128xf32, #tpu.memory_space<vmem>>, vector<16x128xf32>
    %6 = vector.broadcast %4 : f32 to vector<16x128xf32>
    %7 = arith.mulf %6, %5 : vector<16x128xf32>
    %8 = arith.addf %3, %7 : vector<16x128xf32>
    %c2 = arith.constant 2 : index
    %9 = memref.load %arg1[%c2] : memref<3xf32, #tpu.memory_space<smem>>
    %c0_4 = arith.constant 0 : index
    %c0_5 = arith.constant 0 : index
    %10 = vector.load %arg4[%c0_4, %c0_5] : memref<16x128xf32, #tpu.memory_space<vmem>>, vector<16x128xf32>
    %11 = vector.broadcast %9 : f32 to vector<16x128xf32>
    %12 = arith.mulf %11, %10 : vector<16x128xf32>
    %13 = arith.addf %8, %12 : vector<16x128xf32>
    %c0_6 = arith.constant 0 : index
    %c0_7 = arith.constant 0 : index
    %14 = vector.load %arg5[%c0_6, %c0_7] : memref<16x128xf32, #tpu.memory_space<vmem>>, vector<16x128xf32>
    tpu.vector_store %arg5[%c0_6, %c0_7], %13 {strides = array<i32>} : memref<16x128xf32, #tpu.memory_space<vmem>>, vector<16x128xf32>,
    return
  }
  func.func @transform_0(%arg0: i32) -> i32 {
    %c0_i32 = arith.constant 0 : i32
    %c0_i32_0 = arith.constant 0 : i32
    return %c0_i32 : i32
  }
  func.func @transform_1(%arg0: i32) -> (i32, i32) {
    %c0_i32 = arith.constant 0 : i32
    %c0_i32_0 = arith.constant 0 : i32
    return %arg0, %c0_i32 : i32, i32
  }
  func.func @transform_2(%arg0: i32) -> (i32, i32) {
    %c0_i32 = arith.constant 0 : i32
    %c0_i32_0 = arith.constant 0 : i32
    return %arg0, %c0_i32 : i32, i32
  }
  func.func @transform_3(%arg0: i32) -> (i32, i32) {
    %c0_i32 = arith.constant 0 : i32
    %c0_i32_0 = arith.constant 0 : i32
    return %arg0, %c0_i32 : i32, i32
  }
  func.func @transform_4(%arg0: i32) -> (i32, i32) {
    %c0_i32 = arith.constant 0 : i32
    %c0_i32_0 = arith.constant 0 : i32
    return %arg0, %c0_i32 : i32, i32
  }
}

</mosaic_0001>

<bundles_post_ra>
// kernel: tpu_custom_call.1
= control target key start
LH: loop header
LB: loop body
LE: loop exit
PB: predicated region body
PF: predicated region fallthrough
CT: control target
= control target key end

     0   :  { %9 = vsyncpa [#allocation5], 0  ;;  %s307_s0 = inlined_call_operand.hbm [shape: f32[3], index: 0, kind: input, shape index: {}]   ;;  %s308_s1 = inlined_call_operand.hbm [shape: f32[16,128], index: 1, kind: input, shape index: {}]   ;;  %s309_s2 = inlined_call_operand.hbm [shape: f32[16,128], index: 2, kind: input, shape index: {}]   ;;  %s310_s3 = inlined_call_operand.hbm [shape: f32[16,128], index: 3, kind: input, shape index: {}]   ;;  %s311_s4 = inlined_call_operand.hbm [shape: f32[16,128], index: 4, kind: output, shape index: {}]  }
   0x1   :  { %10 = vsyncpa [#allocation3], 0 }
   0x2   :  { %11 = vsyncpa [#allocation8], 0 }
   0x3   :  { %12 = vsyncpa [#allocation4], 0  ;;  %s39_s17 = sshll.u32 %s309_s2, 4  ;;  %s248_s18 = smov [#allocation7]   ;;  %s40_s17 = int_to_ptr.hbm [resolvable:$true] %s39_s17 }
   0x4   :  { %s41_s19 = sshll.u32 %s248_s18, 4  ;;  %s18_s22 = sshll.u32 %s307_s0, 4  ;;  %s42_s19 = int_to_ptr.vmem [resolvable:$true] %s41_s19  ;;  %s19_s22 = int_to_ptr.hbm [resolvable:$true] %s18_s22 }
   0x5   :  { %s249_s23 = smov 128   ;;  %s250_s24 = smov 8  }
   0x6   :  { %47 = dma.hbm_to_vmem [thread:$0]  %s40_s17, 256, %s42_s19, [#allocation8], %s249_s23, %s249_s23, %s250_s24  }
   0x7   :  { %s251_s25 = smov [#allocation2]   ;;  %s26_s2 = sshll.u32 %s308_s1, 4  ;;  %s27_s2 = int_to_ptr.hbm [resolvable:$true] %s26_s2 }
   0x8   :  { %21 = dma.hbm_to_smem %s19_s22, 16, %s251_s25, [#allocation5]  }
   0x9   :  { %s252_s28 = smov [#allocation6]   ;;  %s52_s0 = sshll.u32 %s310_s3, 4  ;;  %s53_s0 = int_to_ptr.hbm [resolvable:$true] %s52_s0 }
   0xa   :  { %s28_s29 = sshll.u32 %s252_s28, 4  ;;  %s253_s6 = smov [#allocation9]   ;;  %s29_s29 = int_to_ptr.vmem [resolvable:$true] %s28_s29 }
   0xb   :  { %34 = dma.hbm_to_vmem [thread:$0]  %s27_s2, 256, %s29_s29, [#allocation3], %s249_s23, %s249_s23, %s250_s24  }
   0xc   :  { %s54_s7 = sshll.u32 %s253_s6, 4  ;;  %s55_s7 = int_to_ptr.vmem [resolvable:$true] %s54_s7 }
   0xd   :  { %60 = dma.hbm_to_vmem [thread:$0]  %s53_s0, 256, %s55_s7, [#allocation8], %s249_s23, %s249_s23, %s250_s24  }
   0xe   :  { %240 = dma.done.wait [#allocation5], 16  }
   0xf   :  { %241 = vsyncadd [#allocation5], 4294967280 }
  0x10   :  { %242 = dma.done.wait [#allocation3], 256  }
  0x11   :  { %243 = vsyncadd [#allocation3], 4294967040 }
  0x12   :  { %244 = dma.done.wait [#allocation8], 512  }
  0x13   :  { %245 = vsyncadd [#allocation8], 4294966784 }
  0x14   :  { %77 = sfence }
  0x15   :  { %s78_s1 = sld [smem:[#allocation2]]  ;;  %v79_v0 = vld [vmem:[#allocation6] sm:$0xff]  ;;  %v80_v1 = vld [vmem:[#allocation6 + $0x8] sm:$0xff]  ;;  %v85_v2 = vld [vmem:[#allocation7] sm:$0xff]  ;;  %s254_s9 = smov [#allocation10]  }
  0x16   :  { %s123_s3 = sld [smem:[#allocation2 + $0x1]]  ;;  %v86_v3 = vld [vmem:[#allocation7 + $0x8] sm:$0xff]  ;;  %v93_v5 = vld [vmem:[#allocation9] sm:$0xff]  ;;  %v94_v6 = vld [vmem:[#allocation9 + $0x8] sm:$0xff]  ;;  %s106_s10 = sshll.u32 %s254_s9, 4  ;;  %s107_s10 = int_to_ptr.vmem [resolvable:$true] %s106_s10 }
  0x17   :  { %s124_s8 = sld [smem:[#allocation2 + $0x2]]  ;;  %s108_s13 = sshll.u32 %s311_s4, 4  ;;  %s109_s13 = int_to_ptr.hbm [resolvable:$true] %s108_s13 }
  0x1b   :  { %v81_v4 = vstv %s78_s1 }
  0x1c   :  { %v82_v7 = vmul.f32 %v81_v4, %v79_v0  ;;  %v87_v8 = vstv %s123_s3  ;;  %v83_v9 = vmul.f32 %v81_v4, %v80_v1 }
  0x1d   :  { %v88_v10 = vmul.f32 %v87_v8, %v85_v2  ;;  %v95_v11 = vstv %s124_s8  ;;  %v89_v12 = vmul.f32 %v87_v8, %v86_v3 }
  0x1e   :  { %v96_v13 = vmul.f32 %v95_v11, %v93_v5  ;;  %v97_v14 = vmul.f32 %v95_v11, %v94_v6 }
  0x1f   :  { %v90_v15 = vadd.f32 %v88_v10, %v82_v7  ;;  %v91_v16 = vadd.f32 %v89_v12, %v83_v9 }
  0x21   :  { %v98_v17 = vadd.f32 %v96_v13, %v90_v15  ;;  %v99_v18 = vadd.f32 %v97_v14, %v91_v16 }
  0x23   :  { %100 = vst [vmem:[#allocation10] sm:$0xff] %v98_v17 }
  0x24   :  { %101 = vst [vmem:[#allocation10 + $0x8] sm:$0xff] %v99_v18 }
  0x25   :  { %114 = dma.vmem_to_hbm [thread:$0]  %s107_s10, 256, %s109_s13, [#allocation4], %s249_s23, %s249_s23, %s250_s24  }
  0x26   :  { %246 = dma.done.wait [#allocation4], 256  }
  0x27   :  { %247 = vsyncadd [#allocation4], 4294967040 }
  0x28   :  { %119 = vsyncpa [#allocation3], 1 }
  0x29   :  { %120 = vsyncpa [#allocation8], 1 }
  0x2a   :  { %121 = vsyncpa [#allocation4], 1 }
  0x2b   :  { %122 = vsyncpa [#allocation5], 1 }

</bundles_post_ra>
